<compile_context>
chip_gen: v7x
topology: tpu7x:2x2x1
jax: 0.10.0
libtpu: 0.0.40
codegen_flags: <defaults>
</compile_context>

<pallas_src>
import functools

import jax
import jax.numpy as jnp
from jax.experimental import pallas as pl
from jax.experimental.pallas import tpu as pltpu


# ----------------------------------------------------------------------------
# small helpers
# ----------------------------------------------------------------------------
def _round_up(x, m):
    return ((x + m - 1) // m) * m


def _choose_m_tiling(m, max_tm=2048):
    """Pad M to the tile size (not just 128) and pick a large lane-dense tile."""
    if m <= max_tm:
        tm = _round_up(m, 128)
        return tm, tm                      # single grid step
    return _round_up(m, max_tm), max_tm


def _vmem_limit(kdim, coutp, tm, out_bytes, n_patch_buf, has_stats):
    """VMEM budget from the real (multi-)buffered block footprint + headroom."""
    w_b = coutp * kdim * 2 * 2                    # resident bf16 weight (2 bufs)
    p_b = kdim * tm * 2 * n_patch_buf             # bf16 patch tiles
    b_b = coutp * 128 * 4 * 2                     # bias column (lane-padded)
    y_b = coutp * tm * max(out_bytes, 2) * 2      # output tiles
    s_b = (2 * coutp * 128 * 4 * 2) if has_stats else 0
    total = int(1.25 * (w_b + p_b + b_b + y_b + s_b)) + (8 << 20)
    # stay comfortably under v7x's 64 MiB physical VMEM; fine for v5e/v6e too.
    return max(16 << 20, min(48 << 20, total))


# ----------------------------------------------------------------------------
# Pallas kernels  (transposed layout:  W (CoutP,K) @ P^T (K,TM) -> (CoutP,TM))
# ----------------------------------------------------------------------------
def _mm_bias_act_kernel(w_ref, p_ref, b_ref, o_ref, *, act, slope):
    y = jnp.dot(w_ref[...], p_ref[...], preferred_element_type=jnp.float32)
    y = y + b_ref[...]
    if act:
        y = jnp.where(y >= 0.0, y, slope * y)
    o_ref[...] = y.astype(o_ref.dtype)


def _mm_bias_stats_kernel(w_ref, p_ref, b_ref, y_ref, sum_ref, sq_ref,
                          *, m_real, tm):
    i = pl.program_id(0)
    y = jnp.dot(w_ref[...], p_ref[...], preferred_element_type=jnp.float32)
    y = y + b_ref[...]
    y_ref[...] = y.astype(y_ref.dtype)

    # mask padded M columns so batch statistics stay exact; per-tile partials
    # (no grid-resident accumulator) keep the M axis fully "parallel".
    col = jax.lax.broadcasted_iota(jnp.int32, y.shape, 1) + i * tm
    ym = jnp.where(col < m_real, y, 0.0)
    sum_ref[...] = jnp.sum(ym, axis=1, keepdims=True)[None]
    sq_ref[...] = jnp.sum(ym * ym, axis=1, keepdims=True)[None]


# ----------------------------------------------------------------------------
# Glue: transposed im2col (K-major patches) on CNHW activations
# ----------------------------------------------------------------------------
def extract_patches_t(x, k, stride, pad):
    # x: (C, N, H, W) -> (C*k*k, N*Ho*Wo)  (row order ci*k*k + i*k + j, matching
    #                                       w.reshape(Cout, -1))
    if pad > 0:
        x = jnp.pad(x, ((0, 0), (0, 0), (pad, pad), (pad, pad)))
    c, n, h, w = x.shape
    ho = (h - k) // stride + 1
    wo = (w - k) // stride + 1
    taps = []
    for i in range(k):
        for j in range(k):
            taps.append(x[:, :, i:i + stride * ho:stride,
                          j:j + stride * wo:stride])      # (C, N, Ho, Wo)
    pt = jnp.stack(taps, axis=1)                          # (C, k*k, N, Ho, Wo)
    return pt.reshape(c * k * k, n * ho * wo), ho, wo


# ----------------------------------------------------------------------------
# One conv layer:  [prev-BN affine + lrelu] -> conv (+bias) [+ BN stats] [+ lrelu]
# ----------------------------------------------------------------------------
def conv_layer(x_cnhw, w, b, n, *, k, s, p, act=False, bn=False, gamma=None,
               beta=None, pre_scale=None, pre_shift=None, slope=0.2, eps=1e-5,
               out_dtype=jnp.bfloat16):
    cout = w.shape[0]

    # Fuse the PREVIOUS layer's BatchNorm affine + leaky-ReLU here: it becomes a
    # cheap elementwise producer of the patch-extraction fusion (no separate Pallas
    # pass / HBM round trip) and zero-padding semantics of this conv stay exact.
    if pre_scale is not None:
        xf = (x_cnhw.astype(jnp.float32) * pre_scale[:, None, None, None]
              + pre_shift[:, None, None, None])
        x_cnhw = jnp.where(xf >= 0.0, xf, slope * xf).astype(jnp.bfloat16)

    pt, ho, wo = extract_patches_t(x_cnhw.astype(jnp.bfloat16), k, s, p)
    kdim, m = pt.shape
    m_pad, tm = _choose_m_tiling(m)
    if m_pad != m:
        pt = jnp.pad(pt, ((0, 0), (0, m_pad - m)))
    n_tiles = m_pad // tm

    coutp = _round_up(cout, 16)     # full bf16 sublane tile -> unmasked stores
    w_mat = jnp.pad(w.reshape(cout, -1),
                    ((0, coutp - cout), (0, 0))).astype(jnp.bfloat16)
    b_col = jnp.pad(b.reshape(cout, 1),
                    ((0, coutp - cout), (0, 0))).astype(jnp.float32)

    if n_tiles >= 3:
        patch_spec = pl.BlockSpec((kdim, tm), lambda i: (0, i),
                                  pipeline_mode=pl.Buffered(3))
        n_patch_buf = 3
    else:
        patch_spec = pl.BlockSpec((kdim, tm), lambda i: (0, i))
        n_patch_buf = 2

    in_specs = [
        pl.BlockSpec((coutp, kdim), lambda i: (0, 0)),   # weight: resident
        patch_spec,                                      # patches: tiled over M
        pl.BlockSpec((coutp, 1), lambda i: (0, 0)),      # bias: resident
    ]
    grid = (n_tiles,)
    out_bytes = jnp.dtype(out_dtype).itemsize

    if not bn:
        vlim = _vmem_limit(kdim, coutp, tm, out_bytes, n_patch_buf, False)
        y = pl.pallas_call(
            functools.partial(_mm_bias_act_kernel, act=act, slope=slope),
            out_shape=jax.ShapeDtypeStruct((coutp, m_pad), out_dtype),
            grid=grid,
            in_specs=in_specs,
            out_specs=pl.BlockSpec((coutp, tm), lambda i: (0, i)),
            compiler_params=pltpu.CompilerParams(
                dimension_semantics=("parallel",),
                vmem_limit_bytes=vlim),
        )(w_mat, pt, b_col)
        return y[:cout, :m].reshape(cout, n, ho, wo)

    # BN layer: matmul + bias -> bf16 y + per-tile partial stats (all "parallel").
    vlim = _vmem_limit(kdim, coutp, tm, 2, n_patch_buf, True)
    y, psum, psq = pl.pallas_call(
        functools.partial(_mm_bias_stats_kernel, m_real=m, tm=tm),
        out_shape=(jax.ShapeDtypeStruct((coutp, m_pad), jnp.bfloat16),
                   jax.ShapeDtypeStruct((n_tiles, coutp, 1), jnp.float32),
                   jax.ShapeDtypeStruct((n_tiles, coutp, 1), jnp.float32)),
        grid=grid,
        in_specs=in_specs,
        out_specs=(pl.BlockSpec((coutp, tm), lambda i: (0, i)),
                   pl.BlockSpec((1, coutp, 1), lambda i: (i, 0, 0)),
                   pl.BlockSpec((1, coutp, 1), lambda i: (i, 0, 0))),
        compiler_params=pltpu.CompilerParams(
            dimension_semantics=("parallel",),
            vmem_limit_bytes=vlim),
    )(w_mat, pt, b_col)

    # tiny JAX finalize: reduce per-tile partials -> training-mode batch stats
    csum = jnp.sum(psum, axis=0)[:cout, 0]
    csq = jnp.sum(psq, axis=0)[:cout, 0]
    mean = csum / m
    # TODO(synk): E[x^2]-E[x]^2 can cancel for very large M; switch to a shifted /
    # Welford accumulation if tighter BN agreement with PyTorch is ever needed.
    var = jnp.maximum(csq / m - mean * mean, 0.0)
    inv = jax.lax.rsqrt(var + eps)
    scale = gamma.astype(jnp.float32) * inv
    shift = beta.astype(jnp.float32) - mean * scale

    y_cnhw = y[:cout, :m].reshape(cout, n, ho, wo)
    return y_cnhw, scale, shift


# ----------------------------------------------------------------------------
# Glue: spectral normalization (one power iteration, PyTorch default)
# ----------------------------------------------------------------------------
def spectral_normalize(w, u0, n_iter=1, eps=1e-12):
    cout = w.shape[0]
    w_mat = w.reshape(cout, -1)
    u = u0 / (jnp.linalg.norm(u0) + eps)
    v = None
    for _ in range(n_iter):
        v = w_mat.T @ u
        v = v / (jnp.linalg.norm(v) + eps)
        u = w_mat @ v
        u = u / (jnp.linalg.norm(u) + eps)
    sigma = u @ (w_mat @ v)
    return w / sigma


# ----------------------------------------------------------------------------
# Discriminator forward (use_spectral_norm=True, use_minibatch=False)
# ----------------------------------------------------------------------------
def discriminator_forward(params, layout_logits, cond, cond_dim):
    n, _, h, w = layout_logits.shape
    cond_idx = jnp.clip(cond[:, 0].astype(jnp.int32), 0, 127)
    cond_vec = params["cond_emb"][cond_idx]                      # (N, cond_dim)

    # CNHW ("transposed") layout end-to-end: one small transpose on the input.
    x_c = jnp.transpose(layout_logits, (1, 0, 2, 3))             # (C, N, H, W)
    cond_map = jnp.broadcast_to(jnp.transpose(cond_vec)[:, :, None, None],
                                (cond_dim, n, h, w))
    merged = jnp.concatenate([x_c, cond_map], axis=0).astype(jnp.bfloat16)

    x1 = conv_layer(merged, params["w1"], params["b1"], n,
                    k=4, s=2, p=1, act=True)
    x2, sc2, sh2 = conv_layer(x1, params["w2"], params["b2"], n,
                              k=4, s=2, p=1, bn=True,
                              gamma=params["bn2_g"], beta=params["bn2_b"])
    x3, sc3, sh3 = conv_layer(x2, params["w3"], params["b3"], n,
                              k=4, s=2, p=1, bn=True,
                              gamma=params["bn3_g"], beta=params["bn3_b"],
                              pre_scale=sc2, pre_shift=sh2)
    out = conv_layer(x3, params["w4"], params["b4"], n,
                     k=4, s=1, p=0, act=False, out_dtype=jnp.float32,
                     pre_scale=sc3, pre_shift=sh3)                # (1, N, h', w')
    return jnp.transpose(out, (1, 0, 2, 3))                       # (N, 1, h', w')


# ----------------------------------------------------------------------------
# Pure-JAX reference (for a loose correctness check)
# ----------------------------------------------------------------------------
def reference_forward(params, layout_logits, cond, cond_dim):
    n, _, h, w = layout_logits.shape
    idx = jnp.clip(cond[:, 0].astype(jnp.int32), 0, 127)
    emb = params["cond_emb"][idx]
    cmap = jnp.broadcast_to(emb[:, :, None, None], (n, cond_dim, h, w))
    x = jnp.concatenate([layout_logits, cmap], axis=1)

    def conv(x, w, b, s, p):
        y = jax.lax.conv_general_dilated(
            x, w, window_strides=(s, s), padding=[(p, p), (p, p)],
            dimension_numbers=("NCHW", "OIHW", "NCHW"))
        return y + b[None, :, None, None]

    def bn(x, g, bb, eps=1e-5):
        mean = jnp.mean(x, axis=(0, 2, 3), keepdims=True)
        var = jnp.mean((x - mean) ** 2, axis=(0, 2, 3), keepdims=True)
        return ((x - mean) * jax.lax.rsqrt(var + eps)
                * g[None, :, None, None] + bb[None, :, None, None])

    lrelu = lambda v: jnp.where(v >= 0, v, 0.2 * v)
    x = lrelu(conv(x, params["w1"], params["b1"], 2, 1))
    x = lrelu(bn(conv(x, params["w2"], params["b2"], 2, 1),
                 params["bn2_g"], params["bn2_b"]))
    x = lrelu(bn(conv(x, params["w3"], params["b3"], 2, 1),
                 params["bn3_g"], params["bn3_b"]))
    return conv(x, params["w4"], params["b4"], 1, 0)


# ----------------------------------------------------------------------------
# Deterministic parameter init (synthetic; shapes match Discriminator.__init__)
# ----------------------------------------------------------------------------
def init_params(key, in_channels, cond_dim, base_channels):
    ks = jax.random.split(key, 16)
    bc = base_channels

    def conv_w(k, cout, cin, kh, kw):
        return 0.05 * jax.random.normal(k, (cout, cin, kh, kw), jnp.float32)

    w1 = conv_w(ks[0], bc, in_channels + 1, 4, 4)
    w2 = conv_w(ks[1], bc * 2, bc, 4, 4)
    w3 = conv_w(ks[2], bc * 4, bc * 2, 4, 4)
    w4 = conv_w(ks[3], 1, bc * 4, 4, 4)

    # spectral norm (applied to the effective weights, as spectral_norm() does)
    w1 = spectral_normalize(w1, jax.random.normal(ks[4], (w1.shape[0],)))
    w2 = spectral_normalize(w2, jax.random.normal(ks[5], (w2.shape[0],)))
    w3 = spectral_normalize(w3, jax.random.normal(ks[6], (w3.shape[0],)))
    w4 = spectral_normalize(w4, jax.random.normal(ks[7], (w4.shape[0],)))

    return {
        "cond_emb": jax.random.uniform(ks[8], (128, cond_dim), jnp.float32,
                                       minval=-0.1, maxval=0.1),
        "w1": w1, "b1": 0.01 * jax.random.normal(ks[9], (bc,)),
        "w2": w2, "b2": 0.01 * jax.random.normal(ks[10], (bc * 2,)),
        "w3": w3, "b3": 0.01 * jax.random.normal(ks[11], (bc * 4,)),
        "w4": w4, "b4": 0.01 * jax.random.normal(ks[12], (1,)),
        "bn2_g": jnp.ones((bc * 2,), jnp.float32),
        "bn2_b": jnp.zeros((bc * 2,), jnp.float32),
        "bn3_g": jnp.ones((bc * 4,), jnp.float32),
        "bn3_b": jnp.zeros((bc * 4,), jnp.float32),
    }


if __name__ == "__main__":
    # small config: in_channels=4, cond_dim=1, base_channels=8, N=2, H=W=32
    # (H=W=32 is the smallest spatial size for which conv4 (4x4, valid) is defined
    #  after three stride-2 layers: 32 -> 16 -> 8 -> 4 -> 1)
    N, IN_CH, COND_DIM, BASE_CH, H, W = 2, 4, 1, 8, 32, 32

    key = jax.random.PRNGKey(0)
    k_par, k_x, k_c = jax.random.split(key, 3)

    params = init_params(k_par, IN_CH, COND_DIM, BASE_CH)
    layout_logits = jax.random.normal(k_x, (N, IN_CH, H, W), jnp.float32)
    cond = jnp.stack(
        [jax.random.randint(k_c, (N,), 0, 128).astype(jnp.float32)] * COND_DIM,
        axis=1)                                                  # (N, cond_dim)

    fwd = jax.jit(functools.partial(discriminator_forward, cond_dim=COND_DIM))
    out = jax.block_until_ready(fwd(params, layout_logits, cond))
    assert out.shape == (N, 1, 1, 1), out.shape

    ref = jax.block_until_ready(
        reference_forward(params, layout_logits, cond, COND_DIM))
    max_err = float(jnp.max(jnp.abs(out - ref)))
    assert max_err < 0.1, f"mismatch vs reference: {max_err}"

    print("KERNEL_OK")
</pallas_src>

<mosaic_0001>
module attributes {stable_mosaic.version = 11 : i64} {
  func.func @_mm_bias_act_kernel(%arg0: i32, %arg1: memref<16x80xbf16, #tpu.memory_space<vmem>>, %arg2: memref<80x512xbf16, #tpu.memory_space<vmem>>, %arg3: memref<16x1xf32, #tpu.memory_space<vmem>>, %arg4: memref<16x512xbf16, #tpu.memory_space<vmem>>) attributes {dimension_semantics = [#tpu.dimension_semantics<parallel>], iteration_bounds = array<i64: 1>, scalar_prefetch = 0 : i64, scratch_operands = 0 : i64, tpu.core_type = #tpu.core_type<tc>, window_params = [{pipeline_mode = #tpu.pipeline_mode<synchronous>, transform_indices = @transform_0, window_bounds = array<i64: 16, 80>}, {transform_indices = @transform_1, window_bounds = array<i64: 80, 512>}, {pipeline_mode = #tpu.pipeline_mode<synchronous>, transform_indices = @transform_2, window_bounds = array<i64: 16, 1>}, {transform_indices = @transform_3, window_bounds = array<i64: 16, 512>}]} {
    %c0 = arith.constant 0 : index
    %c0_0 = arith.constant 0 : index
    %0 = vector.load %arg1[%c0, %c0_0] : memref<16x80xbf16, #tpu.memory_space<vmem>>, vector<16x80xbf16>
    %c0_1 = arith.constant 0 : index
    %c0_2 = arith.constant 0 : index
    %1 = vector.load %arg2[%c0_1, %c0_2] : memref<80x512xbf16, #tpu.memory_space<vmem>>, vector<80x512xbf16>
    %cst = arith.constant dense<0.000000e+00> : vector<16x512xf32>
    %2 = tpu.matmul %0, %1, %cst {dimension_numbers = #tpu.dot_dimension_numbers<[1], [0], [0], [1], [0, 0, 1, 1], [], []>} : vector<16x80xbf16>, vector<80x512xbf16>, vector<16x512xf32> -> vector<16x512xf32>
    %c0_3 = arith.constant 0 : index
    %c0_4 = arith.constant 0 : index
    %3 = vector.load %arg3[%c0_3, %c0_4] : memref<16x1xf32, #tpu.memory_space<vmem>>, vector<16x1xf32>
    %4 = vector.broadcast %3 : vector<16x1xf32> to vector<16x512xf32>
    %5 = arith.addf %2, %4 : vector<16x512xf32>
    %cst_5 = arith.constant 0.000000e+00 : f32
    %6 = vector.broadcast %cst_5 : f32 to vector<16x512xf32>
    %7 = arith.cmpf oge, %5, %6 : vector<16x512xf32>
    %cst_6 = arith.constant 2.000000e-01 : f32
    %8 = vector.broadcast %cst_6 : f32 to vector<16x512xf32>
    %9 = arith.mulf %8, %5 : vector<16x512xf32>
    %10 = arith.select %7, %5, %9 : vector<16x512xi1>, vector<16x512xf32>
    %11 = arith.truncf %10 : vector<16x512xf32> to vector<16x512xbf16>
    %c0_7 = arith.constant 0 : index
    %c0_8 = arith.constant 0 : index
    %12 = vector.load %arg4[%c0_7, %c0_8] : memref<16x512xbf16, #tpu.memory_space<vmem>>, vector<16x512xbf16>
    tpu.vector_store %arg4[%c0_7, %c0_8], %11 {strides = array<i32>} : memref<16x512xbf16, #tpu.memory_space<vmem>>, vector<16x512xbf16>,
    return
  }
  func.func @transform_0(%arg0: i32) -> (i32, i32) {
    %c0_i32 = arith.constant 0 : i32
    %c0_i32_0 = arith.constant 0 : i32
    %c0_i32_1 = arith.constant 0 : i32
    return %c0_i32, %c0_i32_0 : i32, i32
  }
  func.func @transform_1(%arg0: i32) -> (i32, i32) {
    %c0_i32 = arith.constant 0 : i32
    %c0_i32_0 = arith.constant 0 : i32
    return %c0_i32, %arg0 : i32, i32
  }
  func.func @transform_2(%arg0: i32) -> (i32, i32) {
    %c0_i32 = arith.constant 0 : i32
    %c0_i32_0 = arith.constant 0 : i32
    %c0_i32_1 = arith.constant 0 : i32
    return %c0_i32, %c0_i32_0 : i32, i32
  }
  func.func @transform_3(%arg0: i32) -> (i32, i32) {
    %c0_i32 = arith.constant 0 : i32
    %c0_i32_0 = arith.constant 0 : i32
    return %c0_i32, %arg0 : i32, i32
  }
}

module attributes {stable_mosaic.version = 11 : i64} {
  func.func @_mm_bias_stats_kernel(%arg0: i32, %arg1: memref<16x128xbf16, #tpu.memory_space<vmem>>, %arg2: memref<128x128xbf16, #tpu.memory_space<vmem>>, %arg3: memref<16x1xf32, #tpu.memory_space<vmem>>, %arg4: memref<16x128xbf16, #tpu.memory_space<vmem>>, %arg5: memref<1x16x1xf32, #tpu.memory_space<vmem>>, %arg6: memref<1x16x1xf32, #tpu.memory_space<vmem>>) attributes {dimension_semantics = [#tpu.dimension_semantics<parallel>], iteration_bounds = array<i64: 1>, scalar_prefetch = 0 : i64, scratch_operands = 0 : i64, tpu.core_type = #tpu.core_type<tc>, window_params = [{pipeline_mode = #tpu.pipeline_mode<synchronous>, transform_indices = @transform_0, window_bounds = array<i64: 16, 128>}, {transform_indices = @transform_1, window_bounds = array<i64: 128, 128>}, {pipeline_mode = #tpu.pipeline_mode<synchronous>, transform_indices = @transform_2, window_bounds = array<i64: 16, 1>}, {transform_indices = @transform_3, window_bounds = array<i64: 16, 128>}, {transform_indices = @transform_4, window_bounds = array<i64: 1, 16, 1>}, {transform_indices = @transform_5, window_bounds = array<i64: 1, 16, 1>}]} {
    %c0 = arith.constant 0 : index
    %c0_0 = arith.constant 0 : index
    %0 = vector.load %arg1[%c0, %c0_0] : memref<16x128xbf16, #tpu.memory_space<vmem>>, vector<16x128xbf16>
    %c0_1 = arith.constant 0 : index
    %c0_2 = arith.constant 0 : index
    %1 = vector.load %arg2[%c0_1, %c0_2] : memref<128x128xbf16, #tpu.memory_space<vmem>>, vector<128x128xbf16>
    %cst = arith.constant dense<0.000000e+00> : vector<16x128xf32>
    %2 = tpu.matmul %0, %1, %cst {dimension_numbers = #tpu.dot_dimension_numbers<[1], [0], [0], [1], [0, 0, 1, 1], [], []>} : vector<16x128xbf16>, vector<128x128xbf16>, vector<16x128xf32> -> vector<16x128xf32>
    %c0_3 = arith.constant 0 : index
    %c0_4 = arith.constant 0 : index
    %3 = vector.load %arg3[%c0_3, %c0_4] : memref<16x1xf32, #tpu.memory_space<vmem>>, vector<16x1xf32>
    %4 = vector.broadcast %3 : vector<16x1xf32> to vector<16x128xf32>
    %5 = arith.addf %2, %4 : vector<16x128xf32>
    %6 = arith.truncf %5 : vector<16x128xf32> to vector<16x128xbf16>
    %c0_5 = arith.constant 0 : index
    %c0_6 = arith.constant 0 : index
    %7 = vector.load %arg4[%c0_5, %c0_6] : memref<16x128xbf16, #tpu.memory_space<vmem>>, vector<16x128xbf16>
    tpu.vector_store %arg4[%c0_5, %c0_6], %6 {strides = array<i32>} : memref<16x128xbf16, #tpu.memory_space<vmem>>, vector<16x128xbf16>,
    %8 = tpu.iota {dimensions = array<i32: 1>} : vector<16x128xi32>
    %c128_i32 = arith.constant 128 : i32
    %9 = arith.muli %arg0, %c128_i32 : i32
    %10 = vector.broadcast %9 : i32 to vector<16x128xi32>
    %11 = arith.addi %8, %10 : vector<16x128xi32>
    %c128_i32_7 = arith.constant 128 : i32
    %12 = vector.broadcast %c128_i32_7 : i32 to vector<16x128xi32>
    %13 = arith.cmpi slt, %11, %12 : vector<16x128xi32>
    %cst_8 = arith.constant 0.000000e+00 : f32
    %14 = vector.broadcast %cst_8 : f32 to vector<16x128xf32>
    %15 = arith.select %13, %5, %14 : vector<16x128xi1>, vector<16x128xf32>
    %cst_9 = arith.constant dense<0.000000e+00> : vector<16xf32>
    %16 = vector.multi_reduction <add>, %15, %cst_9 [1] : vector<16x128xf32> to vector<16xf32>
    %17 = vector.shape_cast %16 : vector<16xf32> to vector<16x1xf32>
    %18 = vector.shape_cast %17 : vector<16x1xf32> to vector<1x16x1xf32>
    %c0_10 = arith.constant 0 : index
    %c0_11 = arith.constant 0 : index
    %c0_12 = arith.constant 0 : index
    %19 = vector.load %arg5[%c0_10, %c0_11, %c0_12] : memref<1x16x1xf32, #tpu.memory_space<vmem>>, vector<1x16x1xf32>
    tpu.vector_store %arg5[%c0_10, %c0_11, %c0_12], %18 {strides = array<i32>} : memref<1x16x1xf32, #tpu.memory_space<vmem>>, vector<1x16x1xf32>,
    %20 = arith.mulf %15, %15 : vector<16x128xf32>
    %cst_13 = arith.constant dense<0.000000e+00> : vector<16xf32>
    %21 = vector.multi_reduction <add>, %20, %cst_13 [1] : vector<16x128xf32> to vector<16xf32>
    %22 = vector.shape_cast %21 : vector<16xf32> to vector<16x1xf32>
    %23 = vector.shape_cast %22 : vector<16x1xf32> to vector<1x16x1xf32>
    %c0_14 = arith.constant 0 : index
    %c0_15 = arith.constant 0 : index
    %c0_16 = arith.constant 0 : index
    %24 = vector.load %arg6[%c0_14, %c0_15, %c0_16] : memref<1x16x1xf32, #tpu.memory_space<vmem>>, vector<1x16x1xf32>
    tpu.vector_store %arg6[%c0_14, %c0_15, %c0_16], %23 {strides = array<i32>} : memref<1x16x1xf32, #tpu.memory_space<vmem>>, vector<1x16x1xf32>,
    return
  }
  func.func @transform_0(%arg0: i32) -> (i32, i32) {
    %c0_i32 = arith.constant 0 : i32
    %c0_i32_0 = arith.constant 0 : i32
    %c0_i32_1 = arith.constant 0 : i32
    return %c0_i32, %c0_i32_0 : i32, i32
  }
  func.func @transform_1(%arg0: i32) -> (i32, i32) {
    %c0_i32 = arith.constant 0 : i32
    %c0_i32_0 = arith.constant 0 : i32
    return %c0_i32, %arg0 : i32, i32
  }
  func.func @transform_2(%arg0: i32) -> (i32, i32) {
    %c0_i32 = arith.constant 0 : i32
    %c0_i32_0 = arith.constant 0 : i32
    %c0_i32_1 = arith.constant 0 : i32
    return %c0_i32, %c0_i32_0 : i32, i32
  }
  func.func @transform_3(%arg0: i32) -> (i32, i32) {
    %c0_i32 = arith.constant 0 : i32
    %c0_i32_0 = arith.constant 0 : i32
    return %c0_i32, %arg0 : i32, i32
  }
  func.func @transform_4(%arg0: i32) -> (i32, i32, i32) {
    %c0_i32 = arith.constant 0 : i32
    %c0_i32_0 = arith.constant 0 : i32
    %c0_i32_1 = arith.constant 0 : i32
    return %arg0, %c0_i32, %c0_i32_0 : i32, i32, i32
  }
  func.func @transform_5(%arg0: i32) -> (i32, i32, i32) {
    %c0_i32 = arith.constant 0 : i32
    %c0_i32_0 = arith.constant 0 : i32
    %c0_i32_1 = arith.constant 0 : i32
    return %arg0, %c0_i32, %c0_i32_0 : i32, i32, i32
  }
}

module attributes {stable_mosaic.version = 11 : i64} {
  func.func @_mm_bias_stats_kernel(%arg0: i32, %arg1: memref<32x256xbf16, #tpu.memory_space<vmem>>, %arg2: memref<256x128xbf16, #tpu.memory_space<vmem>>, %arg3: memref<32x1xf32, #tpu.memory_space<vmem>>, %arg4: memref<32x128xbf16, #tpu.memory_space<vmem>>, %arg5: memref<1x32x1xf32, #tpu.memory_space<vmem>>, %arg6: memref<1x32x1xf32, #tpu.memory_space<vmem>>) attributes {dimension_semantics = [#tpu.dimension_semantics<parallel>], iteration_bounds = array<i64: 1>, scalar_prefetch = 0 : i64, scratch_operands = 0 : i64, tpu.core_type = #tpu.core_type<tc>, window_params = [{pipeline_mode = #tpu.pipeline_mode<synchronous>, transform_indices = @transform_0, window_bounds = array<i64: 32, 256>}, {transform_indices = @transform_1, window_bounds = array<i64: 256, 128>}, {pipeline_mode = #tpu.pipeline_mode<synchronous>, transform_indices = @transform_2, window_bounds = array<i64: 32, 1>}, {transform_indices = @transform_3, window_bounds = array<i64: 32, 128>}, {transform_indices = @transform_4, window_bounds = array<i64: 1, 32, 1>}, {transform_indices = @transform_5, window_bounds = array<i64: 1, 32, 1>}]} {
    %c0 = arith.constant 0 : index
    %c0_0 = arith.constant 0 : index
    %0 = vector.load %arg1[%c0, %c0_0] : memref<32x256xbf16, #tpu.memory_space<vmem>>, vector<32x256xbf16>
    %c0_1 = arith.constant 0 : index
    %c0_2 = arith.constant 0 : index
    %1 = vector.load %arg2[%c0_1, %c0_2] : memref<256x128xbf16, #tpu.memory_space<vmem>>, vector<256x128xbf16>
    %cst = arith.constant dense<0.000000e+00> : vector<32x128xf32>
    %2 = tpu.matmul %0, %1, %cst {dimension_numbers = #tpu.dot_dimension_numbers<[1], [0], [0], [1], [0, 0, 1, 1], [], []>} : vector<32x256xbf16>, vector<256x128xbf16>, vector<32x128xf32> -> vector<32x128xf32>
    %c0_3 = arith.constant 0 : index
    %c0_4 = arith.constant 0 : index
    %3 = vector.load %arg3[%c0_3, %c0_4] : memref<32x1xf32, #tpu.memory_space<vmem>>, vector<32x1xf32>
    %4 = vector.broadcast %3 : vector<32x1xf32> to vector<32x128xf32>
    %5 = arith.addf %2, %4 : vector<32x128xf32>
    %6 = arith.truncf %5 : vector<32x128xf32> to vector<32x128xbf16>
    %c0_5 = arith.constant 0 : index
    %c0_6 = arith.constant 0 : index
    %7 = vector.load %arg4[%c0_5, %c0_6] : memref<32x128xbf16, #tpu.memory_space<vmem>>, vector<32x128xbf16>
    tpu.vector_store %arg4[%c0_5, %c0_6], %6 {strides = array<i32>} : memref<32x128xbf16, #tpu.memory_space<vmem>>, vector<32x128xbf16>,
    %8 = tpu.iota {dimensions = array<i32: 1>} : vector<32x128xi32>
    %c128_i32 = arith.constant 128 : i32
    %9 = arith.muli %arg0, %c128_i32 : i32
    %10 = vector.broadcast %9 : i32 to vector<32x128xi32>
    %11 = arith.addi %8, %10 : vector<32x128xi32>
    %c32_i32 = arith.constant 32 : i32
    %12 = vector.broadcast %c32_i32 : i32 to vector<32x128xi32>
    %13 = arith.cmpi slt, %11, %12 : vector<32x128xi32>
    %cst_7 = arith.constant 0.000000e+00 : f32
    %14 = vector.broadcast %cst_7 : f32 to vector<32x128xf32>
    %15 = arith.select %13, %5, %14 : vector<32x128xi1>, vector<32x128xf32>
    %cst_8 = arith.constant dense<0.000000e+00> : vector<32xf32>
    %16 = vector.multi_reduction <add>, %15, %cst_8 [1] : vector<32x128xf32> to vector<32xf32>
    %17 = vector.shape_cast %16 : vector<32xf32> to vector<32x1xf32>
    %18 = vector.shape_cast %17 : vector<32x1xf32> to vector<1x32x1xf32>
    %c0_9 = arith.constant 0 : index
    %c0_10 = arith.constant 0 : index
    %c0_11 = arith.constant 0 : index
    %19 = vector.load %arg5[%c0_9, %c0_10, %c0_11] : memref<1x32x1xf32, #tpu.memory_space<vmem>>, vector<1x32x1xf32>
    tpu.vector_store %arg5[%c0_9, %c0_10, %c0_11], %18 {strides = array<i32>} : memref<1x32x1xf32, #tpu.memory_space<vmem>>, vector<1x32x1xf32>,
    %20 = arith.mulf %15, %15 : vector<32x128xf32>
    %cst_12 = arith.constant dense<0.000000e+00> : vector<32xf32>
    %21 = vector.multi_reduction <add>, %20, %cst_12 [1] : vector<32x128xf32> to vector<32xf32>
    %22 = vector.shape_cast %21 : vector<32xf32> to vector<32x1xf32>
    %23 = vector.shape_cast %22 : vector<32x1xf32> to vector<1x32x1xf32>
    %c0_13 = arith.constant 0 : index
    %c0_14 = arith.constant 0 : index
    %c0_15 = arith.constant 0 : index
    %24 = vector.load %arg6[%c0_13, %c0_14, %c0_15] : memref<1x32x1xf32, #tpu.memory_space<vmem>>, vector<1x32x1xf32>
    tpu.vector_store %arg6[%c0_13, %c0_14, %c0_15], %23 {strides = array<i32>} : memref<1x32x1xf32, #tpu.memory_space<vmem>>, vector<1x32x1xf32>,
    return
  }
  func.func @transform_0(%arg0: i32) -> (i32, i32) {
    %c0_i32 = arith.constant 0 : i32
    %c0_i32_0 = arith.constant 0 : i32
    %c0_i32_1 = arith.constant 0 : i32
    return %c0_i32, %c0_i32_0 : i32, i32
  }
  func.func @transform_1(%arg0: i32) -> (i32, i32) {
    %c0_i32 = arith.constant 0 : i32
    %c0_i32_0 = arith.constant 0 : i32
    return %c0_i32, %arg0 : i32, i32
  }
  func.func @transform_2(%arg0: i32) -> (i32, i32) {
    %c0_i32 = arith.constant 0 : i32
    %c0_i32_0 = arith.constant 0 : i32
    %c0_i32_1 = arith.constant 0 : i32
    return %c0_i32, %c0_i32_0 : i32, i32
  }
  func.func @transform_3(%arg0: i32) -> (i32, i32) {
    %c0_i32 = arith.constant 0 : i32
    %c0_i32_0 = arith.constant 0 : i32
    return %c0_i32, %arg0 : i32, i32
  }
  func.func @transform_4(%arg0: i32) -> (i32, i32, i32) {
    %c0_i32 = arith.constant 0 : i32
    %c0_i32_0 = arith.constant 0 : i32
    %c0_i32_1 = arith.constant 0 : i32
    return %arg0, %c0_i32, %c0_i32_0 : i32, i32, i32
  }
  func.func @transform_5(%arg0: i32) -> (i32, i32, i32) {
    %c0_i32 = arith.constant 0 : i32
    %c0_i32_0 = arith.constant 0 : i32
    %c0_i32_1 = arith.constant 0 : i32
    return %arg0, %c0_i32, %c0_i32_0 : i32, i32, i32
  }
}

module attributes {stable_mosaic.version = 11 : i64} {
  func.func @_mm_bias_act_kernel(%arg0: i32, %arg1: memref<16x512xbf16, #tpu.memory_space<vmem>>, %arg2: memref<512x128xbf16, #tpu.memory_space<vmem>>, %arg3: memref<16x1xf32, #tpu.memory_space<vmem>>, %arg4: memref<16x128xf32, #tpu.memory_space<vmem>>) attributes {dimension_semantics = [#tpu.dimension_semantics<parallel>], iteration_bounds = array<i64: 1>, scalar_prefetch = 0 : i64, scratch_operands = 0 : i64, tpu.core_type = #tpu.core_type<tc>, window_params = [{pipeline_mode = #tpu.pipeline_mode<synchronous>, transform_indices = @transform_0, window_bounds = array<i64: 16, 512>}, {transform_indices = @transform_1, window_bounds = array<i64: 512, 128>}, {pipeline_mode = #tpu.pipeline_mode<synchronous>, transform_indices = @transform_2, window_bounds = array<i64: 16, 1>}, {transform_indices = @transform_3, window_bounds = array<i64: 16, 128>}]} {
    %c0 = arith.constant 0 : index
    %c0_0 = arith.constant 0 : index
    %0 = vector.load %arg1[%c0, %c0_0] : memref<16x512xbf16, #tpu.memory_space<vmem>>, vector<16x512xbf16>
    %c0_1 = arith.constant 0 : index
    %c0_2 = arith.constant 0 : index
    %1 = vector.load %arg2[%c0_1, %c0_2] : memref<512x128xbf16, #tpu.memory_space<vmem>>, vector<512x128xbf16>
    %cst = arith.constant dense<0.000000e+00> : vector<16x128xf32>
    %2 = tpu.matmul %0, %1, %cst {dimension_numbers = #tpu.dot_dimension_numbers<[1], [0], [0], [1], [0, 0, 1, 1], [], []>} : vector<16x512xbf16>, vector<512x128xbf16>, vector<16x128xf32> -> vector<16x128xf32>
    %c0_3 = arith.constant 0 : index
    %c0_4 = arith.constant 0 : index
    %3 = vector.load %arg3[%c0_3, %c0_4] : memref<16x1xf32, #tpu.memory_space<vmem>>, vector<16x1xf32>
    %4 = vector.broadcast %3 : vector<16x1xf32> to vector<16x128xf32>
    %5 = arith.addf %2, %4 : vector<16x128xf32>
    %c0_5 = arith.constant 0 : index
    %c0_6 = arith.constant 0 : index
    %6 = vector.load %arg4[%c0_5, %c0_6] : memref<16x128xf32, #tpu.memory_space<vmem>>, vector<16x128xf32>
    tpu.vector_store %arg4[%c0_5, %c0_6], %5 {strides = array<i32>} : memref<16x128xf32, #tpu.memory_space<vmem>>, vector<16x128xf32>,
    return
  }
  func.func @transform_0(%arg0: i32) -> (i32, i32) {
    %c0_i32 = arith.constant 0 : i32
    %c0_i32_0 = arith.constant 0 : i32
    %c0_i32_1 = arith.constant 0 : i32
    return %c0_i32, %c0_i32_0 : i32, i32
  }
  func.func @transform_1(%arg0: i32) -> (i32, i32) {
    %c0_i32 = arith.constant 0 : i32
    %c0_i32_0 = arith.constant 0 : i32
    return %c0_i32, %arg0 : i32, i32
  }
  func.func @transform_2(%arg0: i32) -> (i32, i32) {
    %c0_i32 = arith.constant 0 : i32
    %c0_i32_0 = arith.constant 0 : i32
    %c0_i32_1 = arith.constant 0 : i32
    return %c0_i32, %c0_i32_0 : i32, i32
  }
  func.func @transform_3(%arg0: i32) -> (i32, i32) {
    %c0_i32 = arith.constant 0 : i32
    %c0_i32_0 = arith.constant 0 : i32
    return %c0_i32, %arg0 : i32, i32
  }
}

</mosaic_0001>

<bundles_post_ra>
// kernel: discriminator_forward.4
= control target key start
LH: loop header
LB: loop body
LE: loop exit
PB: predicated region body
PF: predicated region fallthrough
CT: control target
= control target key end

     0   :  { %v364_v1 = vmov 0   ;;  %vm154_vm0 = vcmask 654336   ;;  %s466_s1 = inlined_call_operand.vmem [shape: bf16[80,512], index: 1, kind: input, shape index: {}]   ;;  %s467_s2 = inlined_call_operand.vmem [shape: f32[16,1], index: 2, kind: input, shape index: {}]   ;;  %s468_s0 = inlined_call_operand.vmem [shape: bf16[16,80], index: 0, kind: input, shape index: {}]   ;;  %s469_s3 = inlined_call_operand.vmem [shape: bf16[16,512], index: 3, kind: output, shape index: {}]  }
   0x1   :  { %v333_v0 = vld [vmem:[%s466_s1 + $0x4] ss:$16 sps:$4 sm:$0xff]   ;;  %190 = vmatprep.mubr.bf16.mxu0 %v364_v1  ;;  %233 = vmatprep.mubr.bf16.mxu1 %v364_v1  ;;  %v335_v2 = vld [vmem:[%s466_s1 + $0xc] ss:$16 sps:$4 sm:$0xff]   ;;  %v337_v3 = vld [vmem:[%s466_s1] ss:$16 sps:$4 sm:$0xff]  }
   0x2   :  { %332 = vset.pattern.permute.xlu0 %v364_v1  ;;  %158 = vmatprep.subr.bf16.mxu0 %v333_v0  ;;  %v338_v4 = vld [vmem:[%s466_s1 + $0x8] ss:$16 sps:$4 sm:$0xff]   ;;  %v339_v5 = vld [vmem:[%s466_s1 + $0x24] ss:$16 sps:$4 sm:$0xff]   ;;  %v341_v6 = vld [vmem:[%s466_s1 + $0x2c] ss:$16 sps:$4 sm:$0xff]  }
   0x3   :  { %201 = vmatprep.subr.bf16.mxu1 %v335_v2  ;;  %159 = vmatpush1.bf16.msra.mxu0 %v337_v3  ;;  %v343_v7 = vld [vmem:[%s466_s1 + $0x20] ss:$16 sps:$4 sm:$0xff]   ;;  %v344_v8 = vld [vmem:[%s466_s1 + $0x28] ss:$16 sps:$4 sm:$0xff]   ;;  %v345_v9 = vld [vmem:[%s466_s1 + $0x44] ss:$16 sps:$4 sm:$0xff]  }
   0x4   :  { %202 = vmatpush1.bf16.msra.mxu1 %v338_v4  ;;  %160 = vmatprep.subr.bf16.mxu0 %v339_v5  ;;  %v347_v10 = vld [vmem:[%s466_s1 + $0x4c] ss:$16 sps:$4 sm:$0xff]   ;;  %v349_v11 = vld [vmem:[%s466_s1 + $0x40] ss:$16 sps:$4 sm:$0xff]   ;;  %v350_v12 = vld [vmem:[%s466_s1 + $0x48] ss:$16 sps:$4 sm:$0xff]  }
   0x5   :  { %203 = vmatprep.subr.bf16.mxu1 %v341_v6  ;;  %v351_v13 = vld [vmem:[%s466_s1 + $0x64] ss:$16 sps:$4 sm:$0xff]   ;;  %v353_v14 = vld [vmem:[%s466_s1 + $0x6c] ss:$16 sps:$4 sm:$0xff]   ;;  %v355_v15 = vld [vmem:[%s466_s1 + $0x60] ss:$16 sps:$4 sm:$0xff]  }
   0x6   :  { %v356_v16 = vld [vmem:[%s466_s1 + $0x68] ss:$16 sps:$4 sm:$0xff]   ;;  %v357_v17 = vld [vmem:[%s466_s1 + $0x84] ss:$16 sps:$4 sm:$0xff]   ;;  %v359_v18 = vld [vmem:[%s466_s1 + $0x8c] ss:$16 sps:$4 sm:$0xff]  }
   0x7   :  { %161 = vmatpush1.bf16.msra.mxu0 %v343_v7  ;;  %v37_v19 = vld [vmem:[%s467_s2] sm:$0xff]  ;;  %v362_v21 = vld [vmem:[%s466_s1 + $0x88] ss:$16 sps:$4 sm:$0xff]  }
   0x8   :  { %204 = vmatpush1.bf16.msra.mxu1 %v344_v8  ;;  %162 = vmatprep.subr.bf16.mxu0 %v345_v9  ;;  %v361_v20 = vld [vmem:[%s466_s1 + $0x80] ss:$16 sps:$4 sm:$0xff]   ;;  %v38_v22 = vld [vmem:[%s467_s2 + $0x8] sm:$0xff] }
   0x9   :  { %205 = vmatprep.subr.bf16.mxu1 %v347_v10  ;;  %41 = vperm.xlu0 %332, %v37_v19   ;;  %v363_v23 = vld [vmem:[%s468_s0] sm:$0xff]  }
   0xb   :  { %163 = vmatpush1.bf16.msra.mxu0 %v349_v11 }
   0xc   :  { %206 = vmatpush1.bf16.msra.mxu1 %v350_v12  ;;  %164 = vmatprep.subr.bf16.mxu0 %v351_v13 }
   0xd   :  { %207 = vmatprep.subr.bf16.mxu1 %v353_v14  ;;  %46 = vperm.xlu0 %332, %v38_v22  }
   0xf   :  { %165 = vmatpush1.bf16.msra.mxu0 %v355_v15 }
  0x10   :  { %208 = vmatpush1.bf16.msra.mxu1 %v356_v16  ;;  %166 = vmatprep.subr.bf16.mxu0 %v357_v17 }
  0x11   :  { %209 = vmatprep.subr.bf16.mxu1 %v359_v18 }
  0x13   :  { %167 = vmatpush1.bf16.msra.mxu0 %v361_v20 }
  0x14   :  { %210 = vmatpush1.bf16.msra.mxu1 %v362_v21 }
  0x16   :  { %321 = vmatmul.mubr.msk.bf16.vlgmr.msra.gmra.mrb[0].mxu0 %vm154_vm0, %v363_v23 }
  0x17   :  { %322 = vmatmul.mubr.msk.bf16.vlgmr.msra.gmra.mrb[0].mxu1 %vm154_vm0, %v363_v23 }
  0x88   :  { %v42_v24 = vpop.permute.xlu0 %41 }
  0x8c   :  { %v47_v37 = vpop.permute.xlu0 %46 }
  0xe9   :  { %v192_v25 = vpop.f32.mrb[0].mxu0 }
  0xea   :  { %v235_v26 = vpop.f32.mrb[0].mxu1  ;;  %v193_v27 = vadd.f32 %v192_v25, %v42_v24  ;;  %v194_v29 = vpop.f32.mrb[1].mxu0 }
  0xeb   :  { %v236_v28 = vadd.f32 %v235_v26, %v42_v24  ;;  %v237_v30 = vpop.f32.mrb[1].mxu1  ;;  %v195_v31 = vadd.f32 %v194_v29, %v42_v24  ;;  %v196_v33 = vpop.f32.mrb[2].mxu0 }
  0xec   :  { %v238_v32 = vadd.f32 %v237_v30, %v42_v24  ;;  %v239_v34 = vpop.f32.mrb[2].mxu1  ;;  %vm244_vm1 = vcmp.ge.f32.partialorder %v193_v27, 0.0  ;;  %v252_v35 = vmul.f32 0.2, %v193_v27  ;;  %v197_v42 = vadd.f32 %v196_v33, %v47_v37  ;;  %v198_v44 = vpop.f32.mrb[3].mxu0 }
  0xed   :  { %vm246_vm2 = vcmp.ge.f32.partialorder %v236_v28, 0.0  ;;  %v254_v36 = vmul.f32 0.2, %v236_v28  ;;  %vm245_vm3 = vcmp.ge.f32.partialorder %v195_v31, 0.0  ;;  %v253_v38 = vmul.f32 0.2, %v195_v31 }
  0xee   :  { %vm247_vm4 = vcmp.ge.f32.partialorder %v238_v32, 0.0  ;;  %v255_v39 = vmul.f32 0.2, %v238_v32  ;;  %v260_v40 = vsel %vm244_vm1, %v193_v27, %v252_v35  ;;  %v240_v43 = vadd.f32 %v239_v34, %v47_v37  ;;  %v241_v45 = vpop.f32.mrb[3].mxu1 }
  0xef   :  { %v262_v41 = vsel %vm246_vm2, %v236_v28, %v254_v36  ;;  %v261_v46 = vsel %vm245_vm3, %v195_v31, %v253_v38  ;;  %v199_v48 = vadd.f32 %v198_v44, %v47_v37  ;;  %v242_v49 = vadd.f32 %v241_v45, %v47_v37 }
  0xf0   :  { %v263_v47 = vsel %vm247_vm4, %v238_v32, %v255_v39  ;;  %v327_v50 = vpack.c.bf16 %v261_v46, %v260_v40  ;;  %vm248_vm5 = vcmp.ge.f32.partialorder %v197_v42, 0.0  ;;  %v256_v52 = vmul.f32 0.2, %v197_v42 }
  0xf1   :  { %v328_v51 = vpack.c.bf16 %v263_v47, %v262_v41  ;;  %vm250_vm6 = vcmp.ge.f32.partialorder %v240_v43, 0.0  ;;  %v258_v53 = vmul.f32 0.2, %v240_v43  ;;  %vm249_vm7 = vcmp.ge.f32.partialorder %v199_v48, 0.0 }
  0xf2   :  { %v257_v54 = vmul.f32 0.2, %v199_v48  ;;  %292 = vst [vmem:[%s469_s3] sm:$0xff] %v327_v50  ;;  %v264_v55 = vsel %vm248_vm5, %v197_v42, %v256_v52  ;;  %vm251_vm8 = vcmp.ge.f32.partialorder %v242_v49, 0.0  ;;  %v259_v56 = vmul.f32 0.2, %v242_v49 }
  0xf3   :  { %293 = vst [vmem:[%s469_s3 + $0x8] sm:$0xff] %v328_v51  ;;  %v266_v57 = vsel %vm250_vm6, %v240_v43, %v258_v53 }
  0xf4   :  { %v265_v58 = vsel %vm249_vm7, %v199_v48, %v257_v54  ;;  %v267_v60 = vsel %vm251_vm8, %v242_v49, %v259_v56 }
  0xf5   :  { %v329_v59 = vpack.c.bf16 %v265_v58, %v264_v55  ;;  %v330_v61 = vpack.c.bf16 %v267_v60, %v266_v57 }
  0xf7   :  { %294 = vst [vmem:[%s469_s3 + $0x10] sm:$0xff] %v329_v59  ;;  %295 = vst [vmem:[%s469_s3 + $0x18] sm:$0xff] %v330_v61 }

// kernel: discriminator_forward.5
= control target key start
LH: loop header
LB: loop body
LE: loop exit
PB: predicated region body
PF: predicated region fallthrough
CT: control target
= control target key end

     0   :  { %v248_v0 = vmov 0.0   ;;  %vm249_vm0 = vmmov 0   ;;  %v250_v2 = vmov 0   ;;  %vm165_vm1 = vcmask 7168   ;;  %s329_s1 = inlined_call_operand.vmem [shape: bf16[128,128], index: 1, kind: input, shape index: {}]   ;;  %s330_s2 = inlined_call_operand.vmem [shape: f32[16,1], index: 2, kind: input, shape index: {}]   ;;  %s331_s0 = inlined_call_operand.vmem [shape: bf16[16,128], index: 0, kind: input, shape index: {}]   ;;  %s332_s3 = inlined_call_operand.vmem [shape: bf16[16,128], index: 3, kind: output, shape index: {0}]   ;;  %s333_s4 = inlined_call_operand.vmem [shape: f32[1,16,1], index: 4, kind: output, shape index: {1}]   ;;  %s334_s5 = inlined_call_operand.vmem [shape: f32[1,16,1], index: 5, kind: output, shape index: {2}]  }
   0x1   :  { %215 = vmatprep.subr.bf16.mxu0 %v248_v0  ;;  %v239_v1 = vld [vmem:[%s329_s1] sm:$0xff]   ;;  %231 = vmatprep.mubr.msk.bf16.mxu0 %vm249_vm0, %v248_v0  ;;  %v240_v3 = vld [vmem:[%s329_s1 + $0x8] sm:$0xff]   ;;  %v241_v4 = vld [vmem:[%s329_s1 + $0x10] sm:$0xff]  }
   0x2   :  { %238 = vset.pattern.permute.xlu0 %v250_v2  ;;  %216 = vmatpush3.bf16.msra.mxu0 %v239_v1  ;;  %v36_v5 = vld [vmem:[%s330_s2] sm:$0xff]  ;;  %v242_v6 = vld [vmem:[%s329_s1 + $0x18] sm:$0xff]   ;;  %v37_v7 = vld [vmem:[%s330_s2 + $0x8] sm:$0xff] }
   0x3   :  { %217 = vmatprep.subr.bf16.mxu0 %v248_v0  ;;  %40 = vperm.xlu0 %238, %v36_v5   ;;  %v243_v8 = vld [vmem:[%s329_s1 + $0x20] sm:$0xff]   ;;  %v244_v9 = vld [vmem:[%s329_s1 + $0x28] sm:$0xff]   ;;  %v245_v10 = vld [vmem:[%s329_s1 + $0x30] sm:$0xff]  }
   0x4   :  { %v246_v11 = vld [vmem:[%s329_s1 + $0x38] sm:$0xff]   ;;  %v247_v12 = vld [vmem:[%s331_s0] sm:$0xff]  }
   0x6   :  { %218 = vmatpush3.bf16.msra.mxu0 %v240_v3 }
   0x7   :  { %219 = vmatprep.subr.bf16.mxu0 %v248_v0  ;;  %45 = vperm.xlu0 %238, %v37_v7  }
   0xa   :  { %220 = vmatpush3.bf16.msra.mxu0 %v241_v4 }
   0xb   :  { %221 = vmatprep.subr.bf16.mxu0 %v248_v0 }
   0xe   :  { %222 = vmatpush3.bf16.msra.mxu0 %v242_v6 }
   0xf   :  { %223 = vmatprep.subr.bf16.mxu0 %v248_v0 }
  0x12   :  { %224 = vmatpush3.bf16.msra.mxu0 %v243_v8 }
  0x13   :  { %225 = vmatprep.subr.bf16.mxu0 %v248_v0 }
  0x16   :  { %226 = vmatpush3.bf16.msra.mxu0 %v244_v9 }
  0x17   :  { %227 = vmatprep.subr.bf16.mxu0 %v248_v0 }
  0x1a   :  { %228 = vmatpush3.bf16.msra.mxu0 %v245_v10 }
  0x1b   :  { %229 = vmatprep.subr.bf16.mxu0 %v248_v0 }
  0x1e   :  { %230 = vmatpush3.bf16.msra.mxu0 %v246_v11 }
  0x21   :  { %232 = vmatmul.mubr.bf16.vlgmr.msra.gmra.mrb[0].mxu0 %v247_v12 }
  0x82   :  { %v41_v13 = vpop.permute.xlu0 %40 }
  0x86   :  { %v46_v17 = vpop.permute.xlu0 %45 }
  0xf4   :  { %v136_v14 = vpop.f32.mrb[0].mxu0 }
  0xf5   :  { %v137_v15 = vadd.f32 %v136_v14, %v41_v13  ;;  %v233_v16 = vpop.f32.mrb[1].mxu0 }
  0xf6   :  { %v139_v18 = vpop.f32.mrb[2].mxu0 }
  0xf7   :  { %v140_v19 = vadd.f32 %v139_v18, %v46_v17  ;;  %161 = vadd.xlane.f32.xlu1 %v137_v15  ;;  %v234_v20 = vpop.f32.mrb[3].mxu0  ;;  %v168_v21 = vmul.f32 %v137_v15, %v137_v15 }
  0xf9   :  { %v204_v22 = vpack.c.bf16 %v140_v19, %v137_v15  ;;  %170 = vadd.xlane.f32.xlu0 %v168_v21  ;;  %v169_v23 = vmul.f32 %v140_v19, %v140_v19 }
  0xfb   :  { %205 = vst [vmem:[%s332_s3] sm:$0xff] %v204_v22   ;;  %163 = vadd.xlane.f32.xlu1 %v140_v19 }
  0xff   :  { %172 = vadd.xlane.f32.xlu1 %v169_v23 }
 0x184   :  { %v162_v24 = vpop.xlane.xlu1 %161 }
 0x185   :  { %166 = vst.msk [vmem:[%s333_s4] sm:$0xff] %vm165_vm1, %v162_v24 }
 0x186   :  { %v171_v25 = vpop.xlane.xlu0 %170 }
 0x187   :  { %174 = vst.msk [vmem:[%s334_s5] sm:$0xff] %vm165_vm1, %v171_v25 }
 0x188   :  { %v164_v26 = vpop.xlane.xlu1 %163 }
 0x189   :  { %167 = vst.msk [vmem:[%s333_s4 + $0x8] sm:$0xff] %vm165_vm1, %v164_v26 }
 0x18c   :  { %v173_v27 = vpop.xlane.xlu1 %172 }
 0x18d   :  { %175 = vst.msk [vmem:[%s334_s5 + $0x8] sm:$0xff] %vm165_vm1, %v173_v27 }

// kernel: discriminator_forward.6
= control target key start
LH: loop header
LB: loop body
LE: loop exit
PB: predicated region body
PF: predicated region fallthrough
CT: control target
= control target key end

     0   :  { %v422_v1 = vmov 0   ;;  %v263_v26 = vlaneseq  ;;  %vm281_vm1 = vcmask 7168   ;;  %s567_s1 = inlined_call_operand.vmem [shape: bf16[256,128], index: 1, kind: input, shape index: {}]   ;;  %s568_s0 = inlined_call_operand.vmem [shape: bf16[32,256], index: 0, kind: input, shape index: {}]   ;;  %s569_s2 = inlined_call_operand.vmem [shape: f32[32,1], index: 2, kind: input, shape index: {}]   ;;  %s570_s3 = inlined_call_operand.vmem [shape: bf16[32,128], index: 3, kind: output, shape index: {0}]   ;;  %s571_s4 = inlined_call_operand.vmem [shape: f32[1,32,1], index: 4, kind: output, shape index: {1}]   ;;  %s572_s5 = inlined_call_operand.vmem [shape: f32[1,32,1], index: 5, kind: output, shape index: {2}]  }
   0x1   :  { %v400_v0 = vld [vmem:[%s567_s1 + $0x40] sm:$0xff]   ;;  %398 = vset.pattern.permute.xlu0 %v422_v1  ;;  %399 = vset.pattern.permute.xlu1 %v422_v1  ;;  %v402_v3 = vld [vmem:[%s567_s1 + $0x48] sm:$0xff]   ;;  %v404_v5 = vld [vmem:[%s567_s1 + $0x50] sm:$0xff]  }
   0x2   :  { %v401_v2 = vld [vmem:[%s567_s1] sm:$0xff]   ;;  %353 = vmatprep.subr.bf16.mxu0 %v400_v0  ;;  %381 = vmatprep.subr.bf16.mxu1 %v400_v0  ;;  %v403_v4 = vld [vmem:[%s567_s1 + $0x8] sm:$0xff]   ;;  %v405_v6 = vld [vmem:[%s567_s1 + $0x10] sm:$0xff]   ;;  %v264_v29 = vand.u32 127, %v263_v26 }
   0x3   :  { %354 = vmatpush3.bf16.msra.mxu0 %v401_v2  ;;  %389 = vmatpush3.bf16.msra.mxu1 %v401_v2  ;;  %v406_v7 = vld [vmem:[%s567_s1 + $0x58] sm:$0xff]   ;;  %v408_v9 = vld [vmem:[%s567_s1 + $0x60] sm:$0xff]   ;;  %v410_v11 = vld [vmem:[%s567_s1 + $0x68] sm:$0xff]  }
   0x4   :  { %355 = vmatprep.subr.bf16.mxu0 %v402_v3  ;;  %382 = vmatprep.subr.bf16.mxu1 %v402_v3  ;;  %v407_v8 = vld [vmem:[%s567_s1 + $0x18] sm:$0xff]   ;;  %v409_v10 = vld [vmem:[%s567_s1 + $0x20] sm:$0xff]   ;;  %v411_v14 = vld [vmem:[%s567_s1 + $0x28] sm:$0xff]   ;;  %vm268_vm0 = vcmp.lt.s32.totalorder %v264_v29, 32 }
   0x5   :  { %v418_v12 = vld [vmem:[%s568_s0 + $0x4] ss:$8 sps:$4 sm:$0xff]   ;;  %v421_v13 = vld [vmem:[%s568_s0 + $0x14] ss:$8 sps:$4 sm:$0xff]   ;;  %v416_v23 = vld [vmem:[%s568_s0] ss:$8 sps:$4 sm:$0xff]  }
   0x6   :  { %v54_v15 = vld [vmem:[%s569_s2] sm:$0xff]  ;;  %v56_v16 = vld [vmem:[%s569_s2 + $0x10] sm:$0xff]  ;;  %226 = vmatprep.mubr.bf16.mxu0 %v418_v12  ;;  %234 = vmatprep.mubr.bf16.mxu1 %v421_v13  ;;  %v55_v19 = vld [vmem:[%s569_s2 + $0x8] sm:$0xff] }
   0x7   :  { %356 = vmatpush3.bf16.msra.mxu0 %v403_v4  ;;  %390 = vmatpush3.bf16.msra.mxu1 %v403_v4  ;;  %v412_v17 = vld [vmem:[%s567_s1 + $0x70] sm:$0xff]   ;;  %v57_v20 = vld [vmem:[%s569_s2 + $0x18] sm:$0xff] }
   0x8   :  { %357 = vmatprep.subr.bf16.mxu0 %v404_v5  ;;  %383 = vmatprep.subr.bf16.mxu1 %v404_v5  ;;  %v413_v18 = vld [vmem:[%s567_s1 + $0x30] sm:$0xff]   ;;  %v414_v21 = vld [vmem:[%s567_s1 + $0x78] sm:$0xff]  }
   0x9   :  { %60 = vperm.xlu0 %398, %v54_v15   ;;  %70 = vperm.xlu1 %399, %v56_v16   ;;  %v415_v22 = vld [vmem:[%s567_s1 + $0x38] sm:$0xff]  }
   0xa   :  { %v419_v24 = vld [vmem:[%s568_s0 + $0x10] ss:$8 sps:$4 sm:$0xff]  }
   0xb   :  { %358 = vmatpush3.bf16.msra.mxu0 %v405_v6  ;;  %391 = vmatpush3.bf16.msra.mxu1 %v405_v6 }
   0xc   :  { %359 = vmatprep.subr.bf16.mxu0 %v406_v7  ;;  %384 = vmatprep.subr.bf16.mxu1 %v406_v7 }
   0xd   :  { %65 = vperm.xlu0 %398, %v55_v19   ;;  %75 = vperm.xlu1 %399, %v57_v20  }
   0xf   :  { %360 = vmatpush3.bf16.msra.mxu0 %v407_v8  ;;  %392 = vmatpush3.bf16.msra.mxu1 %v407_v8 }
  0x10   :  { %361 = vmatprep.subr.bf16.mxu0 %v408_v9  ;;  %385 = vmatprep.subr.bf16.mxu1 %v408_v9 }
  0x13   :  { %362 = vmatpush3.bf16.msra.mxu0 %v409_v10  ;;  %393 = vmatpush3.bf16.msra.mxu1 %v409_v10 }
  0x14   :  { %363 = vmatprep.subr.bf16.mxu0 %v410_v11  ;;  %386 = vmatprep.subr.bf16.mxu1 %v410_v11 }
  0x17   :  { %364 = vmatpush3.bf16.msra.mxu0 %v411_v14  ;;  %394 = vmatpush3.bf16.msra.mxu1 %v411_v14 }
  0x18   :  { %365 = vmatprep.subr.bf16.mxu0 %v412_v17  ;;  %387 = vmatprep.subr.bf16.mxu1 %v412_v17 }
  0x1b   :  { %366 = vmatpush3.bf16.msra.mxu0 %v413_v18  ;;  %395 = vmatpush3.bf16.msra.mxu1 %v413_v18 }
  0x1c   :  { %367 = vmatprep.subr.bf16.mxu0 %v414_v21  ;;  %388 = vmatprep.subr.bf16.mxu1 %v414_v21 }
  0x1f   :  { %368 = vmatpush3.bf16.msra.mxu0 %v415_v22  ;;  %396 = vmatpush3.bf16.msra.mxu1 %v415_v22 }
  0x22   :  { %227 = vmatmul.mubr.bf16.vlgmr.msra.gmra.mrb[0].mxu0 %v416_v23  ;;  %235 = vmatmul.mubr.bf16.vlgmr.msra.gmra.mrb[0].mxu1 %v419_v24 }
  0x88   :  { %v71_v25 = vpop.permute.xlu1 %70  ;;  %v61_v27 = vpop.permute.xlu0 %60 }
  0x8c   :  { %v76_v28 = vpop.permute.xlu1 %75  ;;  %v66_v44 = vpop.permute.xlu0 %65 }
  0xf5   :  { %v369_v30 = vpop.f32.mrb[0].mxu0  ;;  %v375_v31 = vpop.f32.mrb[0].mxu1 }
  0xf6   :  { %v370_v32 = vpop.f32.mrb[1].mxu0  ;;  %v376_v33 = vpop.f32.mrb[1].mxu1 }
  0xf7   :  { %v371_v34 = vadd.f32 %v370_v32, %v369_v30  ;;  %v372_v35 = vpop.f32.mrb[2].mxu0  ;;  %v377_v36 = vadd.f32 %v376_v33, %v375_v31  ;;  %v378_v37 = vpop.f32.mrb[2].mxu1 }
  0xf8   :  { %v373_v38 = vpop.f32.mrb[3].mxu0  ;;  %v379_v39 = vpop.f32.mrb[3].mxu1 }
  0xf9   :  { %v237_v40 = vadd.f32 %v377_v36, %v71_v25  ;;  %v374_v41 = vadd.f32 %v373_v38, %v372_v35  ;;  %v380_v42 = vadd.f32 %v379_v39, %v378_v37  ;;  %v229_v43 = vadd.f32 %v371_v34, %v61_v27 }
  0xfb   :  { %v240_v45 = vadd.f32 %v380_v42, %v76_v28  ;;  %v269_v46 = vsel %vm268_vm0, %v229_v43, 0.0  ;;  %v232_v47 = vadd.f32 %v374_v41, %v66_v44  ;;  %v271_v51 = vsel %vm268_vm0, %v237_v40, 0.0 }
  0xfc   :  { %273 = vadd.xlane.f32.xlu0 %v269_v46  ;;  %v286_v52 = vmul.f32 %v269_v46, %v269_v46  ;;  %v288_v54 = vmul.f32 %v271_v51, %v271_v51 }
  0xfd   :  { %v350_v48 = vpack.c.bf16 %v240_v45, %v237_v40  ;;  %v270_v49 = vsel %vm268_vm0, %v232_v47, 0.0  ;;  %v345_v50 = vpack.c.bf16 %v232_v47, %v229_v43  ;;  %v272_v53 = vsel %vm268_vm0, %v240_v45, 0.0 }
  0xfe   :  { %275 = vadd.xlane.f32.xlu1 %v270_v49  ;;  %v287_v55 = vmul.f32 %v270_v49, %v270_v49  ;;  %v289_v56 = vmul.f32 %v272_v53, %v272_v53 }
  0xff   :  { %352 = vst [vmem:[%s570_s3 + $0x8] sm:$0xff] %v350_v48   ;;  %346 = vst [vmem:[%s570_s3] sm:$0xff] %v345_v50  }
 0x100   :  { %277 = vadd.xlane.f32.xlu0 %v271_v51 }
 0x102   :  { %290 = vadd.xlane.f32.xlu1 %v286_v52 }
 0x104   :  { %279 = vadd.xlane.f32.xlu0 %v272_v53 }
 0x106   :  { %294 = vadd.xlane.f32.xlu1 %v288_v54 }
 0x108   :  { %292 = vadd.xlane.f32.xlu0 %v287_v55 }
 0x10c   :  { %296 = vadd.xlane.f32.xlu0 %v289_v56 }
 0x189   :  { %v274_v57 = vpop.xlane.xlu0 %273 }
 0x18a   :  { %282 = vst.msk [vmem:[%s571_s4] sm:$0xff] %vm281_vm1, %v274_v57 }
 0x18b   :  { %v276_v58 = vpop.xlane.xlu1 %275 }
 0x18c   :  { %283 = vst.msk [vmem:[%s571_s4 + $0x8] sm:$0xff] %vm281_vm1, %v276_v58 }
 0x18d   :  { %v278_v59 = vpop.xlane.xlu0 %277 }
 0x18e   :  { %284 = vst.msk [vmem:[%s571_s4 + $0x10] sm:$0xff] %vm281_vm1, %v278_v59 }
 0x18f   :  { %v291_v60 = vpop.xlane.xlu1 %290 }
 0x190   :  { %298 = vst.msk [vmem:[%s572_s5] sm:$0xff] %vm281_vm1, %v291_v60 }
 0x191   :  { %v280_v61 = vpop.xlane.xlu0 %279 }
 0x192   :  { %285 = vst.msk [vmem:[%s571_s4 + $0x18] sm:$0xff] %vm281_vm1, %v280_v61 }
 0x193   :  { %v295_v62 = vpop.xlane.xlu1 %294 }
 0x194   :  { %300 = vst.msk [vmem:[%s572_s5 + $0x10] sm:$0xff] %vm281_vm1, %v295_v62 }
 0x195   :  { %v293_v63 = vpop.xlane.xlu0 %292 }
 0x196   :  { %299 = vst.msk [vmem:[%s572_s5 + $0x8] sm:$0xff] %vm281_vm1, %v293_v63 }
 0x199   :  { %v297_v0 = vpop.xlane.xlu0 %296 }
 0x19a   :  { %301 = vst.msk [vmem:[%s572_s5 + $0x18] sm:$0xff] %vm281_vm1, %v297_v0 }

// kernel: discriminator_forward.7
= control target key start
LH: loop header
LB: loop body
LE: loop exit
PB: predicated region body
PF: predicated region fallthrough
CT: control target
= control target key end

     0   :  { %v515_v1 = vmov 0   ;;  %s656_s1 = inlined_call_operand.vmem [shape: bf16[512,128], index: 1, kind: input, shape index: {}]   ;;  %s657_s0 = inlined_call_operand.vmem [shape: bf16[16,512], index: 0, kind: input, shape index: {}]   ;;  %s658_s2 = inlined_call_operand.vmem [shape: f32[16,1], index: 2, kind: input, shape index: {}]   ;;  %s659_s3 = inlined_call_operand.vmem [shape: f32[16,128], index: 3, kind: output, shape index: {}]  }
   0x1   :  { %v477_v0 = vld [vmem:[%s656_s1 + $0x40] sm:$0xff]   ;;  %476 = vset.pattern.permute.xlu0 %v515_v1  ;;  %v481_v5 = vld [vmem:[%s656_s1 + $0x48] sm:$0xff]   ;;  %v485_v9 = vld [vmem:[%s656_s1 + $0x50] sm:$0xff]  }
   0x2   :  { %v478_v2 = vld [vmem:[%s656_s1 + $0xc0] sm:$0xff]   ;;  %431 = vmatprep.subr.bf16.mxu0 %v477_v0  ;;  %v482_v6 = vld [vmem:[%s656_s1 + $0xc8] sm:$0xff]   ;;  %v486_v10 = vld [vmem:[%s656_s1 + $0xd0] sm:$0xff]  }
   0x3   :  { %v479_v3 = vld [vmem:[%s656_s1] sm:$0xff]   ;;  %453 = vmatprep.subr.bf16.mxu1 %v478_v2  ;;  %v483_v7 = vld [vmem:[%s656_s1 + $0x8] sm:$0xff]   ;;  %v487_v11 = vld [vmem:[%s656_s1 + $0x10] sm:$0xff]  }
   0x4   :  { %v480_v4 = vld [vmem:[%s656_s1 + $0x80] sm:$0xff]   ;;  %432 = vmatpush3.bf16.msra.mxu0 %v479_v3  ;;  %v484_v8 = vld [vmem:[%s656_s1 + $0x88] sm:$0xff]   ;;  %v488_v12 = vld [vmem:[%s656_s1 + $0x90] sm:$0xff]  }
   0x5   :  { %454 = vmatpush3.bf16.msra.mxu1 %v480_v4  ;;  %433 = vmatprep.subr.bf16.mxu0 %v481_v5  ;;  %v489_v13 = vld [vmem:[%s656_s1 + $0x58] sm:$0xff]   ;;  %v493_v17 = vld [vmem:[%s656_s1 + $0x60] sm:$0xff]   ;;  %v497_v21 = vld [vmem:[%s656_s1 + $0x68] sm:$0xff]  }
   0x6   :  { %455 = vmatprep.subr.bf16.mxu1 %v482_v6  ;;  %v490_v14 = vld [vmem:[%s656_s1 + $0xd8] sm:$0xff]   ;;  %v494_v18 = vld [vmem:[%s656_s1 + $0xe0] sm:$0xff]   ;;  %v498_v22 = vld [vmem:[%s656_s1 + $0xe8] sm:$0xff]  }
   0x7   :  { %v491_v15 = vld [vmem:[%s656_s1 + $0x18] sm:$0xff]   ;;  %v495_v19 = vld [vmem:[%s656_s1 + $0x20] sm:$0xff]   ;;  %v499_v23 = vld [vmem:[%s656_s1 + $0x28] sm:$0xff]  }
   0x8   :  { %434 = vmatpush3.bf16.msra.mxu0 %v483_v7  ;;  %v492_v16 = vld [vmem:[%s656_s1 + $0x98] sm:$0xff]   ;;  %v496_v20 = vld [vmem:[%s656_s1 + $0xa0] sm:$0xff]   ;;  %v500_v24 = vld [vmem:[%s656_s1 + $0xa8] sm:$0xff]  }
   0x9   :  { %456 = vmatpush3.bf16.msra.mxu1 %v484_v8  ;;  %435 = vmatprep.subr.bf16.mxu0 %v485_v9  ;;  %v501_v25 = vld [vmem:[%s656_s1 + $0x70] sm:$0xff]   ;;  %v505_v29 = vld [vmem:[%s656_s1 + $0x78] sm:$0xff]   ;;  %v83_v37 = vld [vmem:[%s658_s2] sm:$0xff] }
   0xa   :  { %457 = vmatprep.subr.bf16.mxu1 %v486_v10  ;;  %v502_v26 = vld [vmem:[%s656_s1 + $0xf0] sm:$0xff]   ;;  %v506_v30 = vld [vmem:[%s656_s1 + $0xf8] sm:$0xff]   ;;  %87 = vperm.xlu0 %476, %v83_v37   ;;  %v84_v38 = vld [vmem:[%s658_s2 + $0x8] sm:$0xff] }
   0xb   :  { %v503_v27 = vld [vmem:[%s656_s1 + $0x30] sm:$0xff]   ;;  %v507_v31 = vld [vmem:[%s656_s1 + $0x38] sm:$0xff]  }
   0xc   :  { %436 = vmatpush3.bf16.msra.mxu0 %v487_v11  ;;  %v504_v28 = vld [vmem:[%s656_s1 + $0xb0] sm:$0xff]   ;;  %v508_v32 = vld [vmem:[%s656_s1 + $0xb8] sm:$0xff]  }
   0xd   :  { %458 = vmatpush3.bf16.msra.mxu1 %v488_v12  ;;  %437 = vmatprep.subr.bf16.mxu0 %v489_v13  ;;  %v509_v33 = vld [vmem:[%s657_s0] ss:$16 sps:$4 sm:$0xff]   ;;  %v511_v34 = vld [vmem:[%s657_s0 + $0x4] ss:$16 sps:$4 sm:$0xff]   ;;  %v512_v35 = vld [vmem:[%s657_s0 + $0x8] ss:$16 sps:$4 sm:$0xff]  }
   0xe   :  { %459 = vmatprep.subr.bf16.mxu1 %v490_v14  ;;  %v514_v36 = vld [vmem:[%s657_s0 + $0xc] ss:$16 sps:$4 sm:$0xff]   ;;  %339 = vmatprep.mubr.bf16.mxu0 %v511_v34 }
   0xf   :  { %380 = vmatprep.mubr.bf16.mxu1 %v514_v36  ;;  %92 = vperm.xlu0 %476, %v84_v38  }
  0x10   :  { %438 = vmatpush3.bf16.msra.mxu0 %v491_v15 }
  0x11   :  { %460 = vmatpush3.bf16.msra.mxu1 %v492_v16  ;;  %439 = vmatprep.subr.bf16.mxu0 %v493_v17 }
  0x12   :  { %461 = vmatprep.subr.bf16.mxu1 %v494_v18 }
  0x14   :  { %440 = vmatpush3.bf16.msra.mxu0 %v495_v19 }
  0x15   :  { %462 = vmatpush3.bf16.msra.mxu1 %v496_v20  ;;  %441 = vmatprep.subr.bf16.mxu0 %v497_v21 }
  0x16   :  { %463 = vmatprep.subr.bf16.mxu1 %v498_v22 }
  0x18   :  { %442 = vmatpush3.bf16.msra.mxu0 %v499_v23 }
  0x19   :  { %464 = vmatpush3.bf16.msra.mxu1 %v500_v24  ;;  %443 = vmatprep.subr.bf16.mxu0 %v501_v25 }
  0x1a   :  { %465 = vmatprep.subr.bf16.mxu1 %v502_v26 }
  0x1c   :  { %444 = vmatpush3.bf16.msra.mxu0 %v503_v27 }
  0x1d   :  { %466 = vmatpush3.bf16.msra.mxu1 %v504_v28  ;;  %445 = vmatprep.subr.bf16.mxu0 %v505_v29 }
  0x1e   :  { %467 = vmatprep.subr.bf16.mxu1 %v506_v30 }
  0x20   :  { %446 = vmatpush3.bf16.msra.mxu0 %v507_v31 }
  0x21   :  { %468 = vmatpush3.bf16.msra.mxu1 %v508_v32 }
  0x23   :  { %340 = vmatmul.mubr.bf16.vlgmr.msra.gmra.mrb[0].mxu0 %v509_v33 }
  0x24   :  { %381 = vmatmul.mubr.bf16.vlgmr.msra.gmra.mrb[0].mxu1 %v512_v35 }
  0x89   :  { %v88_v39 = vpop.permute.xlu0 %87 }
  0x8e   :  { %v93_v52 = vpop.permute.xlu0 %92 }
  0xf6   :  { %v447_v40 = vpop.f32.mrb[0].mxu0 }
  0xf7   :  { %v469_v41 = vpop.f32.mrb[0].mxu1  ;;  %v448_v42 = vpop.f32.mrb[1].mxu0 }
  0xf8   :  { %v449_v43 = vadd.f32 %v448_v42, %v447_v40  ;;  %v470_v44 = vpop.f32.mrb[1].mxu1  ;;  %v450_v45 = vpop.f32.mrb[2].mxu0 }
  0xf9   :  { %v471_v46 = vadd.f32 %v470_v44, %v469_v41  ;;  %v472_v47 = vpop.f32.mrb[2].mxu1  ;;  %v451_v48 = vpop.f32.mrb[3].mxu0 }
  0xfa   :  { %v342_v49 = vadd.f32 %v449_v43, %v88_v39  ;;  %v452_v50 = vadd.f32 %v451_v48, %v450_v45  ;;  %v473_v51 = vpop.f32.mrb[3].mxu1 }
  0xfb   :  { %v474_v53 = vadd.f32 %v473_v51, %v472_v47 }
  0xfc   :  { %v383_v54 = vadd.f32 %v471_v46, %v342_v49  ;;  %v345_v55 = vadd.f32 %v452_v50, %v93_v52 }
  0xfe   :  { %389 = vst [vmem:[%s659_s3] sm:$0xff] %v383_v54  ;;  %v386_v56 = vadd.f32 %v474_v53, %v345_v55 }
 0x100   :  { %390 = vst [vmem:[%s659_s3 + $0x8] sm:$0xff] %v386_v56 }

</bundles_post_ra>
